<compile_context>
chip_gen: v5e
topology: v5e:2x2
jax: 0.10.0
libtpu: 0.0.40
codegen_flags: <defaults>
</compile_context>

<pallas_src>
import jax
import jax.numpy as jnp
from jax import lax
from jax.experimental import pallas as pl
from jax.experimental.pallas import tpu as pltpu


# ----------------------------- Fused Pallas kernel --------------------------

def _make_rds_kernel(H, W, C, d, halo):
    """Builds the fused per-batch kernel (all shape params are static Python ints)."""
    WC = W * C
    PH = 2 * halo + H  # padded row count of the VMEM scratch buffers

    def kernel(x_ref, wdw_ref, t1_ref, w2_ref, t2_ref, o_ref, xpad_ref, ypad_ref):
        # x_ref  : (1, H, W*C)   packed shuffled input (also the residual branch)
        # wdw_ref: (3*W*C, W*C)  banded depthwise weight, BN1 scale folded, f32
        # t1_ref : (1, W*C)      BN1 shift (tiled across W)
        # w2_ref : (3*W*C, W*C)  banded dilated-conv weight, BN2 scale folded, bf16
        # t2_ref : (1, W*C)      BN2 shift (tiled across W)
        # o_ref  : (1, H, W*C)
        # xpad_ref / ypad_ref : (2*halo + H, W*C) f32 VMEM scratch (row halo)
        x = x_ref[0]                                           # (H, WC) f32
        zhalo = jnp.zeros((halo, WC), jnp.float32)

        # ---- depthwise 3x3 (pad=1) + BN1 + ReLU; row halo built in VMEM ----
        xpad_ref[0:halo, :] = zhalo                            # top halo (aligned)
        xpad_ref[halo + H:PH, :] = zhalo                       # bottom halo (aligned)
        xpad_ref[halo:halo + H, :] = x                         # interior (aligned)
        px = jnp.concatenate(
            [xpad_ref[halo - 1 + dy:halo - 1 + dy + H, :] for dy in range(3)],
            axis=-1)                                           # (H, 3*WC)
        y = jnp.dot(px, wdw_ref[...], preferred_element_type=jnp.float32)
        y = jnp.maximum(y + t1_ref[...], 0.0)                  # (H, WC) f32

        # ---- dilated 3x3 (pad=d, dilation=d) + BN2; single bf16 MXU matmul ----
        ypad_ref[0:halo, :] = zhalo
        ypad_ref[halo + H:PH, :] = zhalo
        ypad_ref[halo:halo + H, :] = y
        py = jnp.concatenate(
            [ypad_ref[halo - d + dy * d:halo - d + dy * d + H, :] for dy in range(3)],
            axis=-1)                                           # (H, 3*WC)
        z = jnp.dot(py.astype(jnp.bfloat16), w2_ref[...],
                    preferred_element_type=jnp.float32)        # (H, WC) f32

        # Dropout2d: identity in eval. Residual = shuffled input. Final ReLU.
        o_ref[0] = jnp.maximum(z + t2_ref[...] + x, 0.0).astype(o_ref.dtype)

    return kernel


# ----------------------------- Parameter packing ----------------------------

def channel_shuffle(x_nchw, groups):
    b, c, h, w = x_nchw.shape
    x = x_nchw.reshape(b, groups, c // groups, h, w)
    x = jnp.transpose(x, (0, 2, 1, 3, 4))
    return x.reshape(b, c, h, w)


def _pack_params(params, W, C, dilated, eps=1e-5):
    """Fold BN scales into the conv weights and build banded, lane-packed weights.

    Packed lane index = w*C + c.  For each vertical tap dy, the (W*C, W*C)
    banded block matrix performs the horizontal taps (including zero padding
    in W) and the channel mixing in a single matmul.
    """
    WC = W * C
    s1 = params["bn1_gamma"] / jnp.sqrt(params["bn1_var"] + eps)
    t1 = params["bn1_beta"] - params["bn1_mean"] * s1
    s2 = params["bn2_gamma"] / jnp.sqrt(params["bn2_var"] + eps)
    t2 = params["bn2_beta"] - params["bn2_mean"] * s2

    win = jnp.arange(W)
    diff = win[:, None] - win[None, :]                         # w_in - w_out

    # Depthwise conv (BN1 scale folded in): block-diagonal in channels, banded in W.
    wdw_s = params["w_dw"] * s1[None, None, :]                 # (3, 3, C)
    dx1 = diff + 1
    valid1 = (dx1 >= 0) & (dx1 <= 2)
    band1 = jnp.where(valid1[None, :, :, None],
                      wdw_s[:, jnp.clip(dx1, 0, 2), :], 0.0)   # (3, W, W, C) [dy,wi,wo,c]
    eye_c = jnp.eye(C, dtype=jnp.float32)
    blocks1 = band1[..., :, None] * eye_c[None, None, None]    # (3, W, W, C, C)
    wdw_packed = jnp.transpose(blocks1, (0, 1, 3, 2, 4)).reshape(3 * WC, WC)

    # Dilated full conv (BN2 scale folded into out-channels): banded in W with stride d.
    d = dilated
    w2_s = params["w2"] * s2[None, None, None, :]              # (3, 3, C, C)
    valid2 = (diff == -d) | (diff == 0) | (diff == d)
    dx2 = jnp.clip(diff // d + 1, 0, 2)
    band2 = jnp.where(valid2[None, :, :, None, None],
                      w2_s[:, dx2, :, :], 0.0)                  # (3, W, W, C, C)
    w2_packed = jnp.transpose(band2, (0, 1, 3, 2, 4)).reshape(3 * WC, WC)
    w2_packed = w2_packed.astype(jnp.bfloat16)                  # bf16 MXU operand

    t1p = jnp.tile(t1, W).reshape(1, WC).astype(jnp.float32)
    t2p = jnp.tile(t2, W).reshape(1, WC).astype(jnp.float32)
    return wdw_packed.astype(jnp.float32), t1p, w2_packed, t2p


# ----------------------------- Forward wrapper ------------------------------

def rds_block_forward(x_nchw, params, dilated):
    """Forward pass of RDSBlock (inference).  Input/Output: NCHW."""
    B, C, H, W = x_nchw.shape
    WC = W * C

    # channel shuffle (pure index permutation) + lane-dense repack: (B, H, W*C)
    xs = channel_shuffle(x_nchw, 4)
    x_packed = jnp.transpose(xs, (0, 2, 3, 1)).reshape(B, H, WC)

    wdw_p, t1p, w2_p, t2p = _pack_params(params, W, C, dilated)

    halo = max(8, ((dilated + 7) // 8) * 8)   # 8-aligned row halo (>= dilation)
    kernel = _make_rds_kernel(H, W, C, dilated, halo)

    out_packed = pl.pallas_call(
        kernel,
        out_shape=jax.ShapeDtypeStruct((B, H, WC), x_packed.dtype),
        grid_spec=pltpu.PrefetchScalarGridSpec(
            num_scalar_prefetch=0,
            grid=(B,),
            in_specs=[
                pl.BlockSpec((1, H, WC), lambda b: (b, 0, 0)),
                pl.BlockSpec((3 * WC, WC), lambda b: (0, 0)),
                pl.BlockSpec((1, WC), lambda b: (0, 0)),
                pl.BlockSpec((3 * WC, WC), lambda b: (0, 0)),
                pl.BlockSpec((1, WC), lambda b: (0, 0)),
            ],
            out_specs=pl.BlockSpec((1, H, WC), lambda b: (b, 0, 0)),
            scratch_shapes=[
                pltpu.VMEM((2 * halo + H, WC), jnp.float32),   # padded x (halo rows)
                pltpu.VMEM((2 * halo + H, WC), jnp.float32),   # padded dw+BN+ReLU result
            ],
        ),
        compiler_params=pltpu.CompilerParams(
            dimension_semantics=("parallel",),                 # B=2 feeds 2 TCs on v7x
            vmem_limit_bytes=32 * 1024 * 1024,
        ),
    )(x_packed, wdw_p, t1p, w2_p, t2p)

    out = out_packed.reshape(B, H, W, C)
    return jnp.transpose(out, (0, 3, 1, 2))                    # NHWC -> NCHW


# ----------------------------- Reference (plain JAX) ------------------------

def rds_block_reference(x_nchw, params, dilated):
    eps = 1e-5
    xs = channel_shuffle(x_nchw, 4)
    C = xs.shape[1]
    w_dw_oihw = jnp.transpose(params["w_dw"], (2, 0, 1))[:, None, :, :]
    y = lax.conv_general_dilated(xs, w_dw_oihw, (1, 1), ((1, 1), (1, 1)),
                                 feature_group_count=C,
                                 dimension_numbers=("NCHW", "OIHW", "NCHW"))
    s1 = params["bn1_gamma"] / jnp.sqrt(params["bn1_var"] + eps)
    t1 = params["bn1_beta"] - params["bn1_mean"] * s1
    y = jnp.maximum(y * s1[None, :, None, None] + t1[None, :, None, None], 0.)
    w2_oihw = jnp.transpose(params["w2"], (3, 2, 0, 1))
    d = dilated
    z = lax.conv_general_dilated(y, w2_oihw, (1, 1), ((d, d), (d, d)),
                                 rhs_dilation=(d, d),
                                 dimension_numbers=("NCHW", "OIHW", "NCHW"))
    s2 = params["bn2_gamma"] / jnp.sqrt(params["bn2_var"] + eps)
    t2 = params["bn2_beta"] - params["bn2_mean"] * s2
    z = z * s2[None, :, None, None] + t2[None, :, None, None]
    return jnp.maximum(z + xs, 0.)


# ----------------------------- Main -----------------------------------------

if __name__ == "__main__":
    B, C, H, W = 2, 8, 16, 16          # channels divisible by 4 (shuffle); W*C = 128
    dilated = 2                        # dropprob irrelevant in eval (Dropout2d == id)

    key = jax.random.PRNGKey(0)
    k = jax.random.split(key, 11)
    x = jax.random.normal(k[0], (B, C, H, W), jnp.float32)

    params = {
        "w_dw": 0.3 * jax.random.normal(k[1], (3, 3, C), jnp.float32),      # (kh,kw,C)
        "w2": 0.2 * jax.random.normal(k[2], (3, 3, C, C), jnp.float32),     # (kh,kw,Ci,Co)
        "bn1_gamma": 1.0 + 0.1 * jax.random.normal(k[3], (C,), jnp.float32),
        "bn1_beta": 0.1 * jax.random.normal(k[4], (C,), jnp.float32),
        "bn1_mean": 0.05 * jax.random.normal(k[5], (C,), jnp.float32),
        "bn1_var": jnp.abs(1.0 + 0.1 * jax.random.normal(k[6], (C,), jnp.float32)),
        "bn2_gamma": 1.0 + 0.1 * jax.random.normal(k[7], (C,), jnp.float32),
        "bn2_beta": 0.1 * jax.random.normal(k[8], (C,), jnp.float32),
        "bn2_mean": 0.05 * jax.random.normal(k[9], (C,), jnp.float32),
        "bn2_var": jnp.abs(1.0 + 0.1 * jax.random.normal(k[10], (C,), jnp.float32)),
    }

    out = jax.jit(lambda a: rds_block_forward(a, params, dilated))(x)
    out = jax.block_until_ready(out)

    ref = jax.block_until_ready(rds_block_reference(x, params, dilated))
    assert out.shape == (B, C, H, W)
    err = float(jnp.max(jnp.abs(out - ref)))
    # Tolerance 2e-2: the dilated-conv matmul uses bf16 MXU operands while the
    # reference is all-f32; typical max error is well below this.
    assert err < 2e-2, f"mismatch vs reference: max abs err = {err}"

    print("KERNEL_OK")
</pallas_src>

<mosaic_0001>
module attributes {stable_mosaic.version = 11 : i64} {
  func.func @kernel(%arg0: i32, %arg1: memref<1x16x128xf32, #tpu.memory_space<vmem>>, %arg2: memref<384x128xf32, #tpu.memory_space<vmem>>, %arg3: memref<1x128xf32, #tpu.memory_space<vmem>>, %arg4: memref<384x128xbf16, #tpu.memory_space<vmem>>, %arg5: memref<1x128xf32, #tpu.memory_space<vmem>>, %arg6: memref<1x16x128xf32, #tpu.memory_space<vmem>>, %arg7: memref<32x128xf32, #tpu.memory_space<vmem>>, %arg8: memref<32x128xf32, #tpu.memory_space<vmem>>) attributes {dimension_semantics = [#tpu.dimension_semantics<parallel>], iteration_bounds = array<i64: 2>, scalar_prefetch = 0 : i64, scratch_operands = 2 : i64, tpu.core_type = #tpu.core_type<tc>, window_params = [{transform_indices = @transform_0, window_bounds = array<i64: 1, 16, 128>}, {pipeline_mode = #tpu.pipeline_mode<synchronous>, transform_indices = @transform_1, window_bounds = array<i64: 384, 128>}, {pipeline_mode = #tpu.pipeline_mode<synchronous>, transform_indices = @transform_2, window_bounds = array<i64: 1, 128>}, {pipeline_mode = #tpu.pipeline_mode<synchronous>, transform_indices = @transform_3, window_bounds = array<i64: 384, 128>}, {pipeline_mode = #tpu.pipeline_mode<synchronous>, transform_indices = @transform_4, window_bounds = array<i64: 1, 128>}, {transform_indices = @transform_5, window_bounds = array<i64: 1, 16, 128>}]} {
    %c0 = arith.constant 0 : index
    %c0_0 = arith.constant 0 : index
    %c0_1 = arith.constant 0 : index
    %0 = vector.load %arg1[%c0, %c0_0, %c0_1] : memref<1x16x128xf32, #tpu.memory_space<vmem>>, vector<1x16x128xf32>
    %1 = vector.shape_cast %0 : vector<1x16x128xf32> to vector<16x128xf32>
    %cst = arith.constant 0.000000e+00 : f32
    %2 = vector.broadcast %cst : f32 to vector<8x128xf32>
    %c0_2 = arith.constant 0 : index
    %c0_3 = arith.constant 0 : index
    %3 = vector.load %arg7[%c0_2, %c0_3] : memref<32x128xf32, #tpu.memory_space<vmem>>, vector<8x128xf32>
    tpu.vector_store %arg7[%c0_2, %c0_3], %2 {strides = array<i32>} : memref<32x128xf32, #tpu.memory_space<vmem>>, vector<8x128xf32>,
    %c24 = arith.constant 24 : index
    %c0_4 = arith.constant 0 : index
    %4 = vector.load %arg7[%c24, %c0_4] : memref<32x128xf32, #tpu.memory_space<vmem>>, vector<8x128xf32>
    tpu.vector_store %arg7[%c24, %c0_4], %2 {strides = array<i32>} : memref<32x128xf32, #tpu.memory_space<vmem>>, vector<8x128xf32>,
    %c8 = arith.constant 8 : index
    %c0_5 = arith.constant 0 : index
    %5 = vector.load %arg7[%c8, %c0_5] : memref<32x128xf32, #tpu.memory_space<vmem>>, vector<16x128xf32>
    tpu.vector_store %arg7[%c8, %c0_5], %1 {strides = array<i32>} : memref<32x128xf32, #tpu.memory_space<vmem>>, vector<16x128xf32>,
    %c7 = arith.constant 7 : index
    %c0_6 = arith.constant 0 : index
    %6 = vector.load %arg7[%c7, %c0_6] : memref<32x128xf32, #tpu.memory_space<vmem>>, vector<16x128xf32>
    %c8_7 = arith.constant 8 : index
    %c0_8 = arith.constant 0 : index
    %7 = vector.load %arg7[%c8_7, %c0_8] : memref<32x128xf32, #tpu.memory_space<vmem>>, vector<16x128xf32>
    %c9 = arith.constant 9 : index
    %c0_9 = arith.constant 0 : index
    %8 = vector.load %arg7[%c9, %c0_9] : memref<32x128xf32, #tpu.memory_space<vmem>>, vector<16x128xf32>
    %9 = tpu.concatenate %6, %7, %8 in 1 : vector<16x128xf32>, vector<16x128xf32>, vector<16x128xf32> -> vector<16x384xf32>
    %c0_10 = arith.constant 0 : index
    %c0_11 = arith.constant 0 : index
    %10 = vector.load %arg2[%c0_10, %c0_11] : memref<384x128xf32, #tpu.memory_space<vmem>>, vector<384x128xf32>
    %cst_12 = arith.constant dense<0.000000e+00> : vector<16x128xf32>
    %11 = tpu.matmul %9, %10, %cst_12 {dimension_numbers = #tpu.dot_dimension_numbers<[1], [0], [0], [1], [0, 0, 1, 1], [], []>} : vector<16x384xf32>, vector<384x128xf32>, vector<16x128xf32> -> vector<16x128xf32>
    %c0_13 = arith.constant 0 : index
    %c0_14 = arith.constant 0 : index
    %12 = vector.load %arg3[%c0_13, %c0_14] : memref<1x128xf32, #tpu.memory_space<vmem>>, vector<1x128xf32>
    %13 = vector.broadcast %12 : vector<1x128xf32> to vector<16x128xf32>
    %14 = arith.addf %11, %13 : vector<16x128xf32>
    %cst_15 = arith.constant 0.000000e+00 : f32
    %15 = vector.broadcast %cst_15 : f32 to vector<16x128xf32>
    %16 = arith.maximumf %14, %15 : vector<16x128xf32>
    %c0_16 = arith.constant 0 : index
    %c0_17 = arith.constant 0 : index
    %17 = vector.load %arg8[%c0_16, %c0_17] : memref<32x128xf32, #tpu.memory_space<vmem>>, vector<8x128xf32>
    tpu.vector_store %arg8[%c0_16, %c0_17], %2 {strides = array<i32>} : memref<32x128xf32, #tpu.memory_space<vmem>>, vector<8x128xf32>,
    %c24_18 = arith.constant 24 : index
    %c0_19 = arith.constant 0 : index
    %18 = vector.load %arg8[%c24_18, %c0_19] : memref<32x128xf32, #tpu.memory_space<vmem>>, vector<8x128xf32>
    tpu.vector_store %arg8[%c24_18, %c0_19], %2 {strides = array<i32>} : memref<32x128xf32, #tpu.memory_space<vmem>>, vector<8x128xf32>,
    %c8_20 = arith.constant 8 : index
    %c0_21 = arith.constant 0 : index
    %19 = vector.load %arg8[%c8_20, %c0_21] : memref<32x128xf32, #tpu.memory_space<vmem>>, vector<16x128xf32>
    tpu.vector_store %arg8[%c8_20, %c0_21], %16 {strides = array<i32>} : memref<32x128xf32, #tpu.memory_space<vmem>>, vector<16x128xf32>,
    %c6 = arith.constant 6 : index
    %c0_22 = arith.constant 0 : index
    %20 = vector.load %arg8[%c6, %c0_22] : memref<32x128xf32, #tpu.memory_space<vmem>>, vector<16x128xf32>
    %c8_23 = arith.constant 8 : index
    %c0_24 = arith.constant 0 : index
    %21 = vector.load %arg8[%c8_23, %c0_24] : memref<32x128xf32, #tpu.memory_space<vmem>>, vector<16x128xf32>
    %c10 = arith.constant 10 : index
    %c0_25 = arith.constant 0 : index
    %22 = vector.load %arg8[%c10, %c0_25] : memref<32x128xf32, #tpu.memory_space<vmem>>, vector<16x128xf32>
    %23 = tpu.concatenate %20, %21, %22 in 1 : vector<16x128xf32>, vector<16x128xf32>, vector<16x128xf32> -> vector<16x384xf32>
    %24 = arith.truncf %23 : vector<16x384xf32> to vector<16x384xbf16>
    %c0_26 = arith.constant 0 : index
    %c0_27 = arith.constant 0 : index
    %25 = vector.load %arg4[%c0_26, %c0_27] : memref<384x128xbf16, #tpu.memory_space<vmem>>, vector<384x128xbf16>
    %cst_28 = arith.constant dense<0.000000e+00> : vector<16x128xf32>
    %26 = tpu.matmul %24, %25, %cst_28 {dimension_numbers = #tpu.dot_dimension_numbers<[1], [0], [0], [1], [0, 0, 1, 1], [], []>} : vector<16x384xbf16>, vector<384x128xbf16>, vector<16x128xf32> -> vector<16x128xf32>
    %c0_29 = arith.constant 0 : index
    %c0_30 = arith.constant 0 : index
    %27 = vector.load %arg5[%c0_29, %c0_30] : memref<1x128xf32, #tpu.memory_space<vmem>>, vector<1x128xf32>
    %28 = vector.broadcast %27 : vector<1x128xf32> to vector<16x128xf32>
    %29 = arith.addf %26, %28 : vector<16x128xf32>
    %30 = arith.addf %29, %1 : vector<16x128xf32>
    %cst_31 = arith.constant 0.000000e+00 : f32
    %31 = vector.broadcast %cst_31 : f32 to vector<16x128xf32>
    %32 = arith.maximumf %30, %31 : vector<16x128xf32>
    %c0_32 = arith.constant 0 : index
    %c0_33 = arith.constant 0 : index
    %c0_34 = arith.constant 0 : index
    %33 = vector.load %arg6[%c0_32, %c0_33, %c0_34] : memref<1x16x128xf32, #tpu.memory_space<vmem>>, vector<1x16x128xf32>
    %34 = vector.shape_cast %33 : vector<1x16x128xf32> to vector<16x128xf32>
    %35 = vector.shape_cast %32 : vector<16x128xf32> to vector<1x16x128xf32>
    tpu.vector_store %arg6[%c0_32, %c0_33, %c0_34], %35 {strides = array<i32>} : memref<1x16x128xf32, #tpu.memory_space<vmem>>, vector<1x16x128xf32>,
    return
  }
  func.func @transform_0(%arg0: i32) -> (i32, i32, i32) {
    %c0_i32 = arith.constant 0 : i32
    %c0_i32_0 = arith.constant 0 : i32
    %c0_i32_1 = arith.constant 0 : i32
    return %arg0, %c0_i32, %c0_i32_0 : i32, i32, i32
  }
  func.func @transform_1(%arg0: i32) -> (i32, i32) {
    %c0_i32 = arith.constant 0 : i32
    %c0_i32_0 = arith.constant 0 : i32
    %c0_i32_1 = arith.constant 0 : i32
    return %c0_i32, %c0_i32_0 : i32, i32
  }
  func.func @transform_2(%arg0: i32) -> (i32, i32) {
    %c0_i32 = arith.constant 0 : i32
    %c0_i32_0 = arith.constant 0 : i32
    %c0_i32_1 = arith.constant 0 : i32
    return %c0_i32, %c0_i32_0 : i32, i32
  }
  func.func @transform_3(%arg0: i32) -> (i32, i32) {
    %c0_i32 = arith.constant 0 : i32
    %c0_i32_0 = arith.constant 0 : i32
    %c0_i32_1 = arith.constant 0 : i32
    return %c0_i32, %c0_i32_0 : i32, i32
  }
  func.func @transform_4(%arg0: i32) -> (i32, i32) {
    %c0_i32 = arith.constant 0 : i32
    %c0_i32_0 = arith.constant 0 : i32
    %c0_i32_1 = arith.constant 0 : i32
    return %c0_i32, %c0_i32_0 : i32, i32
  }
  func.func @transform_5(%arg0: i32) -> (i32, i32, i32) {
    %c0_i32 = arith.constant 0 : i32
    %c0_i32_0 = arith.constant 0 : i32
    %c0_i32_1 = arith.constant 0 : i32
    return %arg0, %c0_i32, %c0_i32_0 : i32, i32, i32
  }
}

</mosaic_0001>

<bundles_post_ra>
// kernel: tile.10
= control target key start
LH: loop header
LB: loop body
LE: loop exit
PB: predicated region body
PF: predicated region fallthrough
CT: control target
= control target key end

     0   :  { %s28_s0 = inlined_call_operand.vmem [shape: f32[8], index: 0, kind: input, shape index: {}]   ;;  %s29_s1 = inlined_call_operand.vmem [shape: f32[16,8], index: 1, kind: output, shape index: {}]  }
   0x1   :  { %v4_v0 = vld [vmem:[%s28_s0] ss:$0 sm:$0xff] }
   0x2   :  { %5 = vst [vmem:[%s29_s1] sm:$0xff] %v4_v0 }
   0x3   :  { %8 = vst [vmem:[%s29_s1 + $0x8] sm:$0xff] %v4_v0 }

// kernel: tile.11
= control target key start
LH: loop header
LB: loop body
LE: loop exit
PB: predicated region body
PF: predicated region fallthrough
CT: control target
= control target key end

     0   :  { %s131_s10 = smov 120   ;;  %s132_s11 = smov 104   ;;  %vm3_vm0 = vcmask 64512   ;;  %vm9_vm1 = vcmask 1048512   ;;  %vm15_vm2 = vcmask 982912   ;;  %vm21_vm3 = vcmask 917312   ;;  %s207_s0 = inlined_call_operand.vmem [shape: f32[16,8], index: 0, kind: input, shape index: {}]   ;;  %s208_s1 = inlined_call_operand.vmem [shape: f32[1,128], index: 1, kind: output, shape index: {}]  }
   0x1   :  { %v101_v0 = vld [vmem:[%s207_s0 + $0xf] sm:$0x1]   ;;  %v103_v1 = vld [vmem:[%s207_s0 + $0xd] sm:$0x1]   ;;  %v105_v2 = vld [vmem:[%s207_s0 + $0xb] sm:$0x1]  }
   0x2   :  { %7 = vrot.lane.b32.xlu0 %v101_v0, %s131_s10  ;;  %19 = vrot.lane.b32.xlu1 %v103_v1, %s132_s11  ;;  %s133_s14 = smov 88   ;;  %v102_v3 = vld [vmem:[%s207_s0 + $0xe] sm:$0x1]   ;;  %v104_v4 = vld [vmem:[%s207_s0 + $0xc] sm:$0x1]   ;;  %s134_s19 = smov 112  }
   0x3   :  { %31 = vrot.lane.b32.xlu2 %v105_v2, %s133_s14  ;;  %s135_s20 = smov 96   ;;  %v106_v5 = vld [vmem:[%s207_s0 + $0xa] sm:$0x1]   ;;  %s136_s23 = smov 80   ;;  %v107_v6 = vld [vmem:[%s207_s0 + $0x9] sm:$0x1]  }
   0x4   :  { %v108_v7 = vld [vmem:[%s207_s0 + $0x8] sm:$0x1]   ;;  %s137_s28 = smov 72   ;;  %s138_s29 = smov 64   ;;  %v109_v8 = vld [vmem:[%s207_s0 + $0x7] sm:$0x1]  }
   0x5   :  { %s139_s3 = smov 56   ;;  %v110_v9 = vld [vmem:[%s207_s0 + $0x6] sm:$0x1]   ;;  %v111_v10 = vld [vmem:[%s207_s0 + $0x5] sm:$0x1]   ;;  %s140_s8 = smov 48  }
   0x6   :  { %s141_s9 = smov 40   ;;  %v112_v11 = vld [vmem:[%s207_s0 + $0x4] sm:$0x1]   ;;  %s142_s12 = smov 32   ;;  %v113_v12 = vld [vmem:[%s207_s0 + $0x3] sm:$0x1]  }
   0x7   :  { %v114_v13 = vld [vmem:[%s207_s0 + $0x2] sm:$0x1]   ;;  %s143_s17 = smov 24   ;;  %s144_s18 = smov 16   ;;  %v115_v14 = vld [vmem:[%s207_s0 + $0x1] sm:$0x1]  }
   0x8   :  { %s145_s21 = smov 8   ;;  %v2_v15 = vld [vmem:[%s207_s0] sm:$0x1]   ;;  %vm27_vm4 = vcmask 851712   ;;  %vm33_vm5 = vcmask 786112   ;;  %vm39_vm6 = vcmask 720512  }
   0x9   :  { %4 = vst.msk [vmem:[#allocation0] sm:$0x1] %vm3_vm0, %v2_v15   ;;  %vm45_vm7 = vcmask 654912   ;;  %vm51_vm8 = vcmask 589312   ;;  %vm57_vm9 = vcmask 523712   ;;  %vm63_vm10 = vcmask 458112  }
   0xa   :  { %13 = vrot.lane.b32.xlu0 %v102_v3, %s134_s19  ;;  %25 = vrot.lane.b32.xlu1 %v104_v4, %s135_s20  ;;  %vm69_vm11 = vcmask 392512   ;;  %vm75_vm12 = vcmask 326912   ;;  %vm81_vm13 = vcmask 261312   ;;  %vm87_vm14 = vcmask 195712  }
   0xb   :  { %37 = vrot.lane.b32.xlu2 %v106_v5, %s136_s23  ;;  %vm93_vm15 = vcmask 130112  }
  0x12   :  { %43 = vrot.lane.b32.xlu0 %v107_v6, %s137_s28  ;;  %49 = vrot.lane.b32.xlu1 %v108_v7, %s138_s29 }
  0x13   :  { %55 = vrot.lane.b32.xlu2 %v109_v8, %s139_s3 }
  0x1a   :  { %61 = vrot.lane.b32.xlu0 %v110_v9, %s140_s8  ;;  %67 = vrot.lane.b32.xlu1 %v111_v10, %s141_s9 }
  0x1b   :  { %73 = vrot.lane.b32.xlu2 %v112_v11, %s142_s12 }
  0x22   :  { %79 = vrot.lane.b32.xlu0 %v113_v12, %s143_s17  ;;  %85 = vrot.lane.b32.xlu1 %v114_v13, %s144_s18 }
  0x23   :  { %91 = vrot.lane.b32.xlu2 %v115_v14, %s145_s21 }
  0x5d   :  { %v32_v16 = vpop.permute.xlu2 %31  }
  0x65   :  { %v38_v17 = vpop.permute.xlu2 %37  }
  0x6d   :  { %v56_v18 = vpop.permute.xlu2 %55  }
  0x74   :  { %v8_v19 = vpop.permute.xlu0 %7   ;;  %v20_v20 = vpop.permute.xlu1 %19  }
  0x75   :  { %10 = vst.msk [vmem:[#allocation0] sm:$0x1] %vm9_vm1, %v8_v19   ;;  %v74_v21 = vpop.permute.xlu2 %73  }
  0x7c   :  { %v14_v22 = vpop.permute.xlu0 %13   ;;  %v26_v23 = vpop.permute.xlu1 %25  }
  0x7d   :  { %16 = vst.msk [vmem:[#allocation0] sm:$0x1] %vm15_vm2, %v14_v22   ;;  %v92_v24 = vpop.permute.xlu2 %91  }
  0x7e   :  { %22 = vst.msk [vmem:[#allocation0] sm:$0x1] %vm21_vm3, %v20_v20  }
  0x7f   :  { %28 = vst.msk [vmem:[#allocation0] sm:$0x1] %vm27_vm4, %v26_v23  }
  0x80   :  { %34 = vst.msk [vmem:[#allocation0] sm:$0x1] %vm33_vm5, %v32_v16  }
  0x81   :  { %40 = vst.msk [vmem:[#allocation0] sm:$0x1] %vm39_vm6, %v38_v17  }
  0x84   :  { %v44_v25 = vpop.permute.xlu0 %43   ;;  %v50_v26 = vpop.permute.xlu1 %49  }
  0x85   :  { %46 = vst.msk [vmem:[#allocation0] sm:$0x1] %vm45_vm7, %v44_v25  }
  0x86   :  { %52 = vst.msk [vmem:[#allocation0] sm:$0x1] %vm51_vm8, %v50_v26  }
  0x87   :  { %58 = vst.msk [vmem:[#allocation0] sm:$0x1] %vm57_vm9, %v56_v18  }
  0x8c   :  { %v62_v27 = vpop.permute.xlu0 %61   ;;  %v68_v28 = vpop.permute.xlu1 %67  }
  0x8d   :  { %64 = vst.msk [vmem:[#allocation0] sm:$0x1] %vm63_vm10, %v62_v27  }
  0x8e   :  { %70 = vst.msk [vmem:[#allocation0] sm:$0x1] %vm69_vm11, %v68_v28  }
  0x8f   :  { %76 = vst.msk [vmem:[#allocation0] sm:$0x1] %vm75_vm12, %v74_v21  }
  0x94   :  { %v80_v29 = vpop.permute.xlu0 %79   ;;  %v86_v30 = vpop.permute.xlu1 %85  }
  0x95   :  { %82 = vst.msk [vmem:[#allocation0] sm:$0x1] %vm81_vm13, %v80_v29  }
  0x96   :  { %88 = vst.msk [vmem:[#allocation0] sm:$0x1] %vm87_vm14, %v86_v30  }
  0x97   :  { %94 = vst.msk [vmem:[#allocation0] sm:$0x1] %vm93_vm15, %v92_v24  }
  0x9e   :  { %v97_v31 = vld [vmem:[#allocation0] sm:$0x1] }
  0x9f   :  { %100 = vst [vmem:[%s208_s1] sm:$0x1] %v97_v31 }

// kernel: _lambda_.1
= control target key start
LH: loop header
LB: loop body
LE: loop exit
PB: predicated region body
PF: predicated region fallthrough
CT: control target
= control target key end

     0   :  { %s855_s18 = smov 0   ;;  %s1121_s0 = inlined_call_operand.vmem [shape: f32[2,16,128], index: 0, kind: input, shape index: {}]   ;;  %s1122_s1 = inlined_call_operand.vmem [shape: f32[384,128], index: 1, kind: input, shape index: {}]   ;;  %s1123_s2 = inlined_call_operand.vmem [shape: f32[1,128], index: 2, kind: input, shape index: {}]   ;;  %s1124_s3 = inlined_call_operand.vmem [shape: bf16[384,128], index: 3, kind: input, shape index: {}]   ;;  %s1125_s4 = inlined_call_operand.vmem [shape: f32[1,128], index: 4, kind: input, shape index: {}]   ;;  %s1126_s5 = inlined_call_operand.vmem [shape: f32[2,16,128], index: 5, kind: output, shape index: {}]  }
   0x1 LB: > { %s672_s19 = sadd.s32 4294967295, %s822_s18   ;;  %p676_p0 = scmp.ge.s32.totalorder %s822_s18, 1  ;;  %s822_s18 = sphi %s855_s18, %s15_s18  }
   0x2   : > { %p187_p1 = scmp.lt.s32.totalorder %s822_s18, 3 }
   0x4   : > { %p188_p2 = pnand %p676_p0, %p187_p1 }
   0x5   : > { %p880_p3 = scmp.lt.s32.totalorder (!%p188_p2), %s672_s19, 1 }
   0x6   : > { %191 = sbr.rel (%p188_p2) target bundleno = 348 (0x15c), region = 40 }
   0xb   : > { %v284_v0 = vld [vmem:[%s1122_s1 + $0x178] sm:$0xff]  ;;  %v283_v2 = vld [vmem:[%s1122_s1 + $0x170] sm:$0xff]  ;;  %v824_v5 = vmov 0.0   ;;  %v282_v6 = vld [vmem:[%s1122_s1 + $0x168] sm:$0xff]  ;;  %s1129_s19 = smov (!%p880_p3, %s672_s19), 1 }
   0xc   : > { %v252_v1 = vld [vmem:[%s1122_s1 + $0x78] sm:$0xff]  ;;  %335 = vmatpush.msra.mxu2 %v284_v0  ;;  %v251_v3 = vld [vmem:[%s1122_s1 + $0x70] sm:$0xff]  ;;  %227 = vst [vmem:[#allocation2] sm:$0xff] %v824_v5  ;;  %v250_v7 = vld [vmem:[%s1122_s1 + $0x68] sm:$0xff]  ;;  %s779_s9 = sshll.u32 %s1129_s19, 4 }
   0xd   : > { %289 = vmatpush.msra.mxu0 %v252_v1  ;;  %v268_v4 = vld [vmem:[%s1122_s1 + $0xf8] sm:$0xff]  ;;  %v267_v8 = vld [vmem:[%s1122_s1 + $0xf0] sm:$0xff]  ;;  %228 = vst [vmem:[#allocation2 + $0x18] sm:$0xff] %v824_v5  ;;  %v266_v9 = vld [vmem:[%s1122_s1 + $0xe8] sm:$0xff]  ;;  %s219_s24 = scalar_lea.vmem %s1121_s0, %s779_s9  ;;  %s224_s17 = scalar_lea.vmem %s1126_s5, %s779_s9 }
   0xe   : > { %312 = vmatpush.msra.mxu1 %v268_v4  ;;  %336 = vmatpush.msra.mxu2 %v283_v2  ;;  %360 = vst [vmem:[#allocation3] sm:$0xff] %v824_v5  ;;  %v281_v10 = vld [vmem:[%s1122_s1 + $0x160] sm:$0xff]  ;;  %v280_v13 = vld [vmem:[%s1122_s1 + $0x158] sm:$0xff]  ;;  %v279_v16 = vld [vmem:[%s1122_s1 + $0x150] sm:$0xff] }
   0xf   : > { %290 = vmatpush.msra.mxu0 %v251_v3  ;;  %v249_v11 = vld [vmem:[%s1122_s1 + $0x60] sm:$0xff]  ;;  %361 = vst [vmem:[#allocation3 + $0x18] sm:$0xff] %v824_v5  ;;  %v248_v14 = vld [vmem:[%s1122_s1 + $0x58] sm:$0xff]  ;;  %v247_v17 = vld [vmem:[%s1122_s1 + $0x50] sm:$0xff] }
  0x10   : > { %313 = vmatpush.msra.mxu1 %v267_v8  ;;  %337 = vmatpush.msra.mxu2 %v282_v6  ;;  %v265_v12 = vld [vmem:[%s1122_s1 + $0xe0] sm:$0xff]  ;;  %v264_v15 = vld [vmem:[%s1122_s1 + $0xd8] sm:$0xff]  ;;  %v263_v18 = vld [vmem:[%s1122_s1 + $0xd0] sm:$0xff] }
  0x11   : > { %291 = vmatpush.msra.mxu0 %v250_v7  ;;  %v278_v19 = vld [vmem:[%s1122_s1 + $0x148] sm:$0xff]  ;;  %v277_v22 = vld [vmem:[%s1122_s1 + $0x140] sm:$0xff]  ;;  %v276_v25 = vld [vmem:[%s1122_s1 + $0x138] sm:$0xff] }
  0x12   : > { %314 = vmatpush.msra.mxu1 %v266_v9  ;;  %338 = vmatpush.msra.mxu2 %v281_v10  ;;  %v246_v20 = vld [vmem:[%s1122_s1 + $0x48] sm:$0xff]  ;;  %v245_v23 = vld [vmem:[%s1122_s1 + $0x40] sm:$0xff]  ;;  %v244_v26 = vld [vmem:[%s1122_s1 + $0x38] sm:$0xff] }
  0x13   : > { %292 = vmatpush.msra.mxu0 %v249_v11  ;;  %v262_v21 = vld [vmem:[%s1122_s1 + $0xc8] sm:$0xff]  ;;  %v261_v24 = vld [vmem:[%s1122_s1 + $0xc0] sm:$0xff]  ;;  %v260_v27 = vld [vmem:[%s1122_s1 + $0xb8] sm:$0xff] }
  0x14   : > { %315 = vmatpush.msra.mxu1 %v265_v12  ;;  %339 = vmatpush.msra.mxu2 %v280_v13  ;;  %v962_v28 = vld [vmem:[%s219_s24] sm:$0xff]  ;;  %v964_v29 = vld [vmem:[%s219_s24 + $0x8] sm:$0xff]  ;;  %v275_v30 = vld [vmem:[%s1122_s1 + $0x130] sm:$0xff] }
  0x15   : > { %293 = vmatpush.msra.mxu0 %v248_v14  ;;  %v243_v31 = vld [vmem:[%s1122_s1 + $0x30] sm:$0xff]  ;;  %229 = vst [vmem:[#allocation2 + $0x8] sm:$0xff] %v962_v28  ;;  %v788_v32 = vld [vmem:[%s1124_s3 + $0x38] sm:$0xff]  ;;  %v274_v34 = vld [vmem:[%s1122_s1 + $0x128] sm:$0xff] }
  0x16   : > { %316 = vmatpush.msra.mxu1 %v264_v15  ;;  %340 = vmatpush.msra.mxu2 %v279_v16  ;;  %v259_v33 = vld [vmem:[%s1122_s1 + $0xb0] sm:$0xff]  ;;  %230 = vst [vmem:[#allocation2 + $0x10] sm:$0xff] %v964_v29  ;;  %v242_v35 = vld [vmem:[%s1122_s1 + $0x28] sm:$0xff]  ;;  %v273_v37 = vld [vmem:[%s1122_s1 + $0x120] sm:$0xff] }
  0x17   : > { %294 = vmatpush.msra.mxu0 %v247_v17  ;;  %569 = vmatpush.bf16.msra.mxu3 %v788_v32  ;;  %v258_v36 = vld [vmem:[%s1122_s1 + $0xa8] sm:$0xff]  ;;  %v241_v38 = vld [vmem:[%s1122_s1 + $0x20] sm:$0xff]  ;;  %v272_v40 = vld [vmem:[%s1122_s1 + $0x118] sm:$0xff] }
  0x18   : > { %317 = vmatpush.msra.mxu1 %v263_v18  ;;  %341 = vmatpush.msra.mxu2 %v278_v19  ;;  %v257_v39 = vld [vmem:[%s1122_s1 + $0xa0] sm:$0xff]  ;;  %v240_v41 = vld [vmem:[%s1122_s1 + $0x18] sm:$0xff]  ;;  %v271_v43 = vld [vmem:[%s1122_s1 + $0x110] sm:$0xff] }
  0x19   : > { %295 = vmatpush.msra.mxu0 %v246_v20  ;;  %v256_v42 = vld [vmem:[%s1122_s1 + $0x98] sm:$0xff]  ;;  %v239_v44 = vld [vmem:[%s1122_s1 + $0x10] sm:$0xff]  ;;  %v270_v46 = vld [vmem:[%s1122_s1 + $0x108] sm:$0xff] }
  0x1a   : > { %318 = vmatpush.msra.mxu1 %v262_v21  ;;  %342 = vmatpush.msra.mxu2 %v277_v22  ;;  %v255_v45 = vld [vmem:[%s1122_s1 + $0x90] sm:$0xff]  ;;  %v238_v47 = vld [vmem:[%s1122_s1 + $0x8] sm:$0xff]  ;;  %v269_v49 = vld [vmem:[%s1122_s1 + $0x100] sm:$0xff] }
  0x1b   : > { %296 = vmatpush.msra.mxu0 %v245_v23  ;;  %v254_v48 = vld [vmem:[%s1122_s1 + $0x88] sm:$0xff]  ;;  %v237_v50 = vld [vmem:[%s1122_s1] sm:$0xff]  ;;  %v796_v53 = vld [vmem:[%s1124_s3 + $0x78] sm:$0xff] }
  0x1c   : > { %319 = vmatpush.msra.mxu1 %v261_v24  ;;  %343 = vmatpush.msra.mxu2 %v276_v25  ;;  %v231_v52 = vld [vmem:[#allocation2 + $0x7] sm:$0xff]  ;;  %v804_v55 = vld [vmem:[%s1124_s3 + $0xb8] sm:$0xff]  ;;  %v795_v58 = vld [vmem:[%s1124_s3 + $0x70] sm:$0xff] }
  0x1d   : > { %297 = vmatpush.msra.mxu0 %v244_v26  ;;  %v235_v51 = vld [vmem:[#allocation2 + $0x9] sm:$0xff]  ;;  %v253_v54 = vld [vmem:[%s1122_s1 + $0x80] sm:$0xff]  ;;  %v236_v56 = vld [vmem:[#allocation2 + $0x11] sm:$0xff] }
  0x1e   : > { %320 = vmatpush.msra.mxu1 %v260_v27  ;;  %344 = vmatpush.msra.mxu2 %v275_v30  ;;  %v232_v57 = vld [vmem:[#allocation2 + $0xf] sm:$0xff]  ;;  %v793_v62 = vld [vmem:[%s1124_s3 + $0x60] sm:$0xff]  ;;  %v792_v1 = vld [vmem:[%s1124_s3 + $0x58] sm:$0xff] }
  0x1f   : > { %298 = vmatpush.msra.mxu0 %v243_v31  ;;  %v794_v59 = vld [vmem:[%s1124_s3 + $0x68] sm:$0xff]  ;;  %v787_v60 = vld [vmem:[%s1124_s3 + $0x30] sm:$0xff]  ;;  %v785_v2 = vld [vmem:[%s1124_s3 + $0x20] sm:$0xff] }
  0x20   : > { %321 = vmatpush.msra.mxu1 %v259_v33  ;;  %345 = vmatpush.msra.mxu2 %v274_v34  ;;  %v803_v61 = vld [vmem:[%s1124_s3 + $0xb0] sm:$0xff]  ;;  %v786_v63 = vld [vmem:[%s1124_s3 + $0x28] sm:$0xff]  ;;  %v801_v3 = vld [vmem:[%s1124_s3 + $0xa0] sm:$0xff] }
  0x21   : > { %299 = vmatpush.msra.mxu0 %v242_v35  ;;  %570 = vmatpush.bf16.msra.mxu3 %v787_v60  ;;  %v802_v0 = vld [vmem:[%s1124_s3 + $0xa8] sm:$0xff]  ;;  %v791_v4 = vld [vmem:[%s1124_s3 + $0x50] sm:$0xff]  ;;  %v784_v5 = vld [vmem:[%s1124_s3 + $0x18] sm:$0xff] }
  0x22   : > { %322 = vmatpush.msra.mxu1 %v258_v36  ;;  %346 = vmatpush.msra.mxu2 %v273_v37  ;;  %v800_v6 = vld [vmem:[%s1124_s3 + $0x98] sm:$0xff]  ;;  %v790_v7 = vld [vmem:[%s1124_s3 + $0x48] sm:$0xff]  ;;  %v783_v8 = vld [vmem:[%s1124_s3 + $0x10] sm:$0xff] }
  0x23   : > { %300 = vmatpush.msra.mxu0 %v241_v38  ;;  %v799_v9 = vld [vmem:[%s1124_s3 + $0x90] sm:$0xff]  ;;  %v789_v10 = vld [vmem:[%s1124_s3 + $0x40] sm:$0xff]  ;;  %v782_v11 = vld [vmem:[%s1124_s3 + $0x8] sm:$0xff] }
  0x24   : > { %323 = vmatpush.msra.mxu1 %v257_v39  ;;  %347 = vmatpush.msra.mxu2 %v272_v40  ;;  %v798_v12 = vld [vmem:[%s1124_s3 + $0x88] sm:$0xff]  ;;  %v781_v13 = vld [vmem:[%s1124_s3] sm:$0xff] }
  0x25   : > { %301 = vmatpush.msra.mxu0 %v240_v41  ;;  %571 = vmatpush.bf16.msra.mxu3 %v786_v63  ;;  %v797_v14 = vld [vmem:[%s1124_s3 + $0x80] sm:$0xff] }
  0x26   : > { %324 = vmatpush.msra.mxu1 %v256_v42  ;;  %348 = vmatpush.msra.mxu2 %v271_v43  ;;  %v814_v15 = vld [vmem:[%s1123_s2] ss:$0 sm:$0xff] }
  0x27   : > { %302 = vmatpush.msra.mxu0 %v239_v44  ;;  %v815_v39 = vld [vmem:[%s1125_s4] ss:$0 sm:$0xff] }
  0x28   : > { %325 = vmatpush.msra.mxu1 %v255_v45  ;;  %349 = vmatpush.msra.mxu2 %v270_v46 }
  0x29   : > { %303 = vmatpush.msra.mxu0 %v238_v47  ;;  %572 = vmatpush.bf16.msra.mxu3 %v785_v2 }
  0x2a   : > { %326 = vmatpush.msra.mxu1 %v254_v48  ;;  %350 = vmatpush.msra.mxu2 %v269_v49 }
  0x2b   : > { %304 = vmatpush.msra.mxu0 %v237_v50  ;;  %351 = vmatmul.f32.vlgmr.msra.gmra.mxu2 %v235_v51 }
  0x2c   : > { %305 = vmatmul.f32.vlgmr.msra.gmra.mxu0 %v231_v52  ;;  %327 = vmatpush.msra.mxu1 %v253_v54 }
  0x2d   : > { %583 = vmatpush.bf16.msrb.mxu0 %v796_v53  ;;  %328 = vmatmul.f32.vlgmr.msra.gmra.mxu1 %v962_v28 }
  0x2e   : > { %597 = vmatpush.bf16.msrb.mxu1 %v804_v55  ;;  %573 = vmatpush.bf16.msra.mxu3 %v784_v5 }
  0x31   : > { %584 = vmatpush.bf16.msrb.mxu0 %v795_v58 }
  0x32   : > { %598 = vmatpush.bf16.msrb.mxu1 %v803_v61  ;;  %574 = vmatpush.bf16.msra.mxu3 %v783_v8 }
  0x33   : > { %354 = vmatmul.f32.gmra.mxu2 %v236_v56 }
  0x34   : > { %308 = vmatmul.f32.gmra.mxu0 %v232_v57 }
  0x35   : > { %331 = vmatmul.f32.gmra.mxu1 %v964_v29  ;;  %585 = vmatpush.bf16.msrb.mxu0 %v794_v59 }
  0x36   : > { %599 = vmatpush.bf16.msrb.mxu1 %v802_v0  ;;  %575 = vmatpush.bf16.msra.mxu3 %v782_v11 }
  0x39   : > { %586 = vmatpush.bf16.msrb.mxu0 %v793_v62 }
  0x3a   : > { %600 = vmatpush.bf16.msrb.mxu1 %v801_v3  ;;  %576 = vmatpush.bf16.msra.mxu3 %v781_v13 }
  0x3d   : > { %587 = vmatpush.bf16.msrb.mxu0 %v792_v1 }
  0x3e   : > { %601 = vmatpush.bf16.msrb.mxu1 %v800_v6 }
  0x41   : > { %588 = vmatpush.bf16.msrb.mxu0 %v791_v4 }
  0x42   : > { %602 = vmatpush.bf16.msrb.mxu1 %v799_v9 }
  0x45   : > { %589 = vmatpush.bf16.msrb.mxu0 %v790_v7 }
  0x46   : > { %603 = vmatpush.bf16.msrb.mxu1 %v798_v12 }
  0x49   : > { %590 = vmatpush.bf16.msrb.mxu0 %v789_v10 }
  0x4a   : > { %604 = vmatpush.bf16.msrb.mxu1 %v797_v14 }
  0xa9   : > { %v306_v16 = vpop.f32.mrf.mxu0 }
  0xaa   : > { %v307_v17 = vadd.f32 %v814_v15, %v306_v16  ;;  %v329_v18 = vpop.f32.mrf.mxu1 }
  0xac   : > { %v330_v19 = vadd.f32 %v329_v18, %v307_v17 }
  0xae   : > { %v352_v20 = vpop.f32.mrf.mxu2 }
  0xaf   : > { %v353_v21 = vadd.f32 %v352_v20, %v330_v19 }
  0xb1   : > { %v309_v22 = vpop.f32.mrf.mxu0  ;;  %v358_v23 = vmax.f32 %v353_v21, 0.0 }
  0xb2   : > { %v310_v24 = vadd.f32 %v814_v15, %v309_v22  ;;  %v332_v25 = vpop.f32.mrf.mxu1 }
  0xb3   : > { %362 = vst [vmem:[#allocation3 + $0x8] sm:$0xff] %v358_v23 }
  0xb4   : > { %v333_v26 = vadd.f32 %v332_v25, %v310_v24 }
  0xb6   : > { %v355_v27 = vpop.f32.mrf.mxu2 }
  0xb7   : > { %v356_v30 = vadd.f32 %v355_v27, %v333_v26 }
  0xb9   : > { %v359_v31 = vmax.f32 %v356_v30, 0.0 }
  0xba   : > { %v364_v33 = vld [vmem:[#allocation3 + $0x6] sm:$0xff] }
  0xbb   : > { %363 = vst [vmem:[#allocation3 + $0x10] sm:$0xff] %v359_v31  ;;  %v371_v32 = vpack.c.bf16 %v359_v31, %v358_v23 }
  0xbd   : > { %591 = vmatmul.bf16.vlgmr.msrb.gmra.mxu0 %v371_v32 }
  0xc2   : > { %v365_v34 = vld [vmem:[#allocation3 + $0xe] sm:$0xff] }
  0xc3   : > { %v368_v35 = vld [vmem:[#allocation3 + $0xa] sm:$0xff]  ;;  %v369_v36 = vld [vmem:[#allocation3 + $0x12] sm:$0xff]  ;;  %v370_v37 = vpack.c.bf16 %v365_v34, %v364_v33 }
  0xc4   : > { %v372_v38 = vpack.c.bf16 %v369_v36, %v368_v35 }
  0xc5   : > { %577 = vmatmul.bf16.vlgmr.msra.gmra.mxu3 %v370_v37 }
  0xc6   : > { %605 = vmatmul.bf16.vlgmr.msrb.gmra.mxu1 %v372_v38 }
 0x13a   : > { %v592_v40 = vpop.f32.mrf.mxu0 }
 0x142   : > { %v594_v50 = vpop.f32.mrf.mxu0 }
 0x143   : > { %v606_v43 = vpop.f32.mrf.mxu1 }
 0x148   : > { %v578_v41 = vpop.f32.mrf.mxu3 }
 0x149   : > { %v579_v42 = vadd.f32 %v815_v39, %v578_v41 }
 0x14b   : > { %v593_v44 = vadd.f32 %v592_v40, %v579_v42  ;;  %v608_v52 = vpop.f32.mrf.mxu1 }
 0x14d   : > { %v607_v45 = vadd.f32 %v606_v43, %v593_v44 }
 0x14f   : > { %v611_v46 = vadd.f32 %v607_v45, %v962_v28 }
 0x150   : > { %v580_v47 = vpop.f32.mrf.mxu3 }
 0x151   : > { %v613_v48 = vmax.f32 %v611_v46, 0.0  ;;  %v581_v49 = vadd.f32 %v815_v39, %v580_v47 }
 0x153   : > { %615 = vst [vmem:[%s224_s17] sm:$0xff] %v613_v48  ;;  %v595_v51 = vadd.f32 %v594_v50, %v581_v49 }
 0x155   : > { %v609_v53 = vadd.f32 %v608_v52, %v595_v51 }
 0x157   : > { %v612_v54 = vadd.f32 %v609_v53, %v964_v29 }
 0x159   : > { %v614_v55 = vmax.f32 %v612_v54, 0.0 }
 0x15b   : > { %616 = vst [vmem:[%s224_s17 + $0x8] sm:$0xff] %v614_v55 }
 0x15c PF: > { %s15_s18 = sadd.s32 1, %s822_s18  }
 0x15d   : > { %p12_p4 = scmp.ge.s32.totalorder %s15_s18, 4  }
 0x15f   :  { %14 = sbr.rel (!%p12_p4) target bundleno = 1 (0x1), region = 70 }

</bundles_post_ra>
